<compile_context>
chip_gen: v7x
topology: tpu7x:2x2x1
jax: 0.10.0
libtpu: 0.0.40
codegen_flags: <defaults>
</compile_context>

<pallas_src>
import functools

import jax
import jax.numpy as jnp
from jax.experimental import pallas as pl
from jax.experimental.pallas import tpu as pltpu

H1 = 512
H2 = 256
OUT_PAD = 128  # lane-dense output width; real out_dim is sliced out in the wrapper


def qnet_kernel(x_ref, w1_ref, b1_ref, w2_ref, b2_ref, w3_ref, b3_ref, o_ref):
    # x: (TB, in) bf16; weights bf16 [in, out]; biases f32 (1, out).
    x = x_ref[...]

    # fc1 + relu  (MXU in bf16, f32 accumulate; epilogue in f32)
    h1 = jnp.dot(x, w1_ref[...], preferred_element_type=jnp.float32) + b1_ref[...]
    h1 = jnp.maximum(h1, 0.0).astype(jnp.bfloat16)

    # fc2 + relu
    h2 = jnp.dot(h1, w2_ref[...], preferred_element_type=jnp.float32) + b2_ref[...]
    h2 = jnp.maximum(h2, 0.0).astype(jnp.bfloat16)

    # fc3 (no activation), lane-dense padded output
    o_ref[...] = (
        jnp.dot(h2, w3_ref[...], preferred_element_type=jnp.float32) + b3_ref[...]
    ).astype(o_ref.dtype)


@functools.partial(jax.jit, static_argnames=("tb",))
def qnetwork_forward(x, params, *, tb=512):
    """x: [B, input_dim] f32. params: dict of w1,b1,w2,b2,w3,b3 (f32, [in,out])."""
    B, in_dim = x.shape
    out_dim = params["w3"].shape[1]

    # Batch tile: multiple of 8, capped at `tb`; pad batch to a multiple of it.
    tb_eff = min(tb, max(8, ((B + 7) // 8) * 8))
    b_pad = pl.cdiv(B, tb_eff) * tb_eff

    # bf16 weights/activations for the MXU; keep biases in f32 for the epilogue.
    x_bf = x.astype(jnp.bfloat16)
    if b_pad != B:
        x_bf = jnp.pad(x_bf, ((0, b_pad - B), (0, 0)))

    w1 = params["w1"].astype(jnp.bfloat16)
    w2 = params["w2"].astype(jnp.bfloat16)
    b1 = params["b1"].astype(jnp.float32)
    b2 = params["b2"].astype(jnp.float32)

    # Zero-pad the last layer to 128 lanes (lane-dense stores, free on the MXU).
    w3 = jnp.zeros((H2, OUT_PAD), jnp.bfloat16).at[:, :out_dim].set(
        params["w3"].astype(jnp.bfloat16)
    )
    b3 = jnp.zeros((1, OUT_PAD), jnp.float32).at[:, :out_dim].set(
        params["b3"].astype(jnp.float32)
    )

    grid = (b_pad // tb_eff,)
    out_padded = pl.pallas_call(
        qnet_kernel,
        out_shape=jax.ShapeDtypeStruct((b_pad, OUT_PAD), jnp.float32),
        grid=grid,
        in_specs=[
            pl.BlockSpec((tb_eff, in_dim), lambda i: (i, 0)),  # x: streamed per tile
            pl.BlockSpec((in_dim, H1), lambda i: (0, 0)),      # w1: resident
            pl.BlockSpec((1, H1), lambda i: (0, 0)),           # b1: resident
            pl.BlockSpec((H1, H2), lambda i: (0, 0)),          # w2: resident
            pl.BlockSpec((1, H2), lambda i: (0, 0)),           # b2: resident
            pl.BlockSpec((H2, OUT_PAD), lambda i: (0, 0)),     # w3: resident
            pl.BlockSpec((1, OUT_PAD), lambda i: (0, 0)),      # b3: resident
        ],
        out_specs=pl.BlockSpec((tb_eff, OUT_PAD), lambda i: (i, 0)),
        compiler_params=pltpu.CompilerParams(
            dimension_semantics=("parallel",),  # shard batch tiles across TCs (v7x)
        ),
    )(x_bf, w1, b1, w2, b2, w3, b3)

    return out_padded[:B, :out_dim]


def init_params(key, input_dim, output_dim):
    """Deterministic init mimicking nn.Linear's uniform(-1/sqrt(fan_in), 1/sqrt(fan_in))."""
    dims = [(input_dim, H1), (H1, H2), (H2, output_dim)]
    params = {}
    for i, (fan_in, fan_out) in enumerate(dims, start=1):
        key, kw, kb = jax.random.split(key, 3)
        bound = 1.0 / jnp.sqrt(fan_in)
        # stored as [in, out] (transposed vs. PyTorch's [out, in])
        params[f"w{i}"] = jax.random.uniform(
            kw, (fan_in, fan_out), jnp.float32, -bound, bound
        )
        params[f"b{i}"] = jax.random.uniform(
            kb, (1, fan_out), jnp.float32, -bound, bound
        )
    return params


def qnetwork_ref(x, w1, b1, w2, b2, w3, b3):
    h1 = jnp.maximum(x @ w1 + b1, 0.0)
    h2 = jnp.maximum(h1 @ w2 + b2, 0.0)
    return h2 @ w3 + b3


if __name__ == "__main__":
    key = jax.random.PRNGKey(0)
    key, kx = jax.random.split(key)

    batch, input_dim, output_dim = 8, 32, 8
    x = jax.random.normal(kx, (batch, input_dim), jnp.float32)
    params = init_params(key, input_dim, output_dim)

    out = jax.block_until_ready(qnetwork_forward(x, params))
    assert out.shape == (batch, output_dim)

    # Reference 1: same bf16 weight/activation quantization, f32 math (tight check).
    bf = lambda a: a.astype(jnp.bfloat16).astype(jnp.float32)
    ref_bf16 = qnetwork_ref(
        bf(x), bf(params["w1"]), params["b1"], bf(params["w2"]), params["b2"],
        bf(params["w3"]), params["b3"],
    )
    assert jnp.allclose(out, ref_bf16, atol=2e-3, rtol=2e-3), (
        float(jnp.max(jnp.abs(out - ref_bf16)))
    )

    # Reference 2: full f32 PyTorch-equivalent forward (loose check due to bf16 weights).
    ref_f32 = qnetwork_ref(
        x, params["w1"], params["b1"], params["w2"], params["b2"],
        params["w3"], params["b3"],
    )
    assert jnp.allclose(out, ref_f32, atol=5e-2, rtol=5e-2), (
        float(jnp.max(jnp.abs(out - ref_f32)))
    )

    print("KERNEL_OK")
</pallas_src>

<mosaic_0001>
module attributes {stable_mosaic.version = 11 : i64} {
  func.func @qnet_kernel(%arg0: i32, %arg1: memref<8x32xbf16, #tpu.memory_space<vmem>>, %arg2: memref<32x512xbf16, #tpu.memory_space<vmem>>, %arg3: memref<1x512xf32, #tpu.memory_space<vmem>>, %arg4: memref<512x256xbf16, #tpu.memory_space<vmem>>, %arg5: memref<1x256xf32, #tpu.memory_space<vmem>>, %arg6: memref<256x128xbf16, #tpu.memory_space<vmem>>, %arg7: memref<1x128xf32, #tpu.memory_space<vmem>>, %arg8: memref<8x128xf32, #tpu.memory_space<vmem>>) attributes {dimension_semantics = [#tpu.dimension_semantics<parallel>], iteration_bounds = array<i64: 1>, scalar_prefetch = 0 : i64, scratch_operands = 0 : i64, tpu.core_type = #tpu.core_type<tc>, window_params = [{transform_indices = @transform_0, window_bounds = array<i64: 8, 32>}, {pipeline_mode = #tpu.pipeline_mode<synchronous>, transform_indices = @transform_1, window_bounds = array<i64: 32, 512>}, {pipeline_mode = #tpu.pipeline_mode<synchronous>, transform_indices = @transform_2, window_bounds = array<i64: 1, 512>}, {pipeline_mode = #tpu.pipeline_mode<synchronous>, transform_indices = @transform_3, window_bounds = array<i64: 512, 256>}, {pipeline_mode = #tpu.pipeline_mode<synchronous>, transform_indices = @transform_4, window_bounds = array<i64: 1, 256>}, {pipeline_mode = #tpu.pipeline_mode<synchronous>, transform_indices = @transform_5, window_bounds = array<i64: 256, 128>}, {pipeline_mode = #tpu.pipeline_mode<synchronous>, transform_indices = @transform_6, window_bounds = array<i64: 1, 128>}, {transform_indices = @transform_7, window_bounds = array<i64: 8, 128>}]} {
    %c0 = arith.constant 0 : index
    %c0_0 = arith.constant 0 : index
    %0 = vector.load %arg1[%c0, %c0_0] : memref<8x32xbf16, #tpu.memory_space<vmem>>, vector<8x32xbf16>
    %c0_1 = arith.constant 0 : index
    %c0_2 = arith.constant 0 : index
    %1 = vector.load %arg2[%c0_1, %c0_2] : memref<32x512xbf16, #tpu.memory_space<vmem>>, vector<32x512xbf16>
    %cst = arith.constant dense<0.000000e+00> : vector<8x512xf32>
    %2 = tpu.matmul %0, %1, %cst {dimension_numbers = #tpu.dot_dimension_numbers<[1], [0], [0], [1], [0, 0, 1, 1], [], []>} : vector<8x32xbf16>, vector<32x512xbf16>, vector<8x512xf32> -> vector<8x512xf32>
    %c0_3 = arith.constant 0 : index
    %c0_4 = arith.constant 0 : index
    %3 = vector.load %arg3[%c0_3, %c0_4] : memref<1x512xf32, #tpu.memory_space<vmem>>, vector<1x512xf32>
    %4 = vector.broadcast %3 : vector<1x512xf32> to vector<8x512xf32>
    %5 = arith.addf %2, %4 : vector<8x512xf32>
    %cst_5 = arith.constant 0.000000e+00 : f32
    %6 = vector.broadcast %cst_5 : f32 to vector<8x512xf32>
    %7 = arith.maximumf %5, %6 : vector<8x512xf32>
    %8 = arith.truncf %7 : vector<8x512xf32> to vector<8x512xbf16>
    %c0_6 = arith.constant 0 : index
    %c0_7 = arith.constant 0 : index
    %9 = vector.load %arg4[%c0_6, %c0_7] : memref<512x256xbf16, #tpu.memory_space<vmem>>, vector<512x256xbf16>
    %cst_8 = arith.constant dense<0.000000e+00> : vector<8x256xf32>
    %10 = tpu.matmul %8, %9, %cst_8 {dimension_numbers = #tpu.dot_dimension_numbers<[1], [0], [0], [1], [0, 0, 1, 1], [], []>} : vector<8x512xbf16>, vector<512x256xbf16>, vector<8x256xf32> -> vector<8x256xf32>
    %c0_9 = arith.constant 0 : index
    %c0_10 = arith.constant 0 : index
    %11 = vector.load %arg5[%c0_9, %c0_10] : memref<1x256xf32, #tpu.memory_space<vmem>>, vector<1x256xf32>
    %12 = vector.broadcast %11 : vector<1x256xf32> to vector<8x256xf32>
    %13 = arith.addf %10, %12 : vector<8x256xf32>
    %cst_11 = arith.constant 0.000000e+00 : f32
    %14 = vector.broadcast %cst_11 : f32 to vector<8x256xf32>
    %15 = arith.maximumf %13, %14 : vector<8x256xf32>
    %16 = arith.truncf %15 : vector<8x256xf32> to vector<8x256xbf16>
    %c0_12 = arith.constant 0 : index
    %c0_13 = arith.constant 0 : index
    %17 = vector.load %arg6[%c0_12, %c0_13] : memref<256x128xbf16, #tpu.memory_space<vmem>>, vector<256x128xbf16>
    %cst_14 = arith.constant dense<0.000000e+00> : vector<8x128xf32>
    %18 = tpu.matmul %16, %17, %cst_14 {dimension_numbers = #tpu.dot_dimension_numbers<[1], [0], [0], [1], [0, 0, 1, 1], [], []>} : vector<8x256xbf16>, vector<256x128xbf16>, vector<8x128xf32> -> vector<8x128xf32>
    %c0_15 = arith.constant 0 : index
    %c0_16 = arith.constant 0 : index
    %19 = vector.load %arg7[%c0_15, %c0_16] : memref<1x128xf32, #tpu.memory_space<vmem>>, vector<1x128xf32>
    %20 = vector.broadcast %19 : vector<1x128xf32> to vector<8x128xf32>
    %21 = arith.addf %18, %20 : vector<8x128xf32>
    %c0_17 = arith.constant 0 : index
    %c0_18 = arith.constant 0 : index
    %22 = vector.load %arg8[%c0_17, %c0_18] : memref<8x128xf32, #tpu.memory_space<vmem>>, vector<8x128xf32>
    tpu.vector_store %arg8[%c0_17, %c0_18], %21 {strides = array<i32>} : memref<8x128xf32, #tpu.memory_space<vmem>>, vector<8x128xf32>,
    return
  }
  func.func @transform_0(%arg0: i32) -> (i32, i32) {
    %c0_i32 = arith.constant 0 : i32
    %c0_i32_0 = arith.constant 0 : i32
    return %arg0, %c0_i32 : i32, i32
  }
  func.func @transform_1(%arg0: i32) -> (i32, i32) {
    %c0_i32 = arith.constant 0 : i32
    %c0_i32_0 = arith.constant 0 : i32
    %c0_i32_1 = arith.constant 0 : i32
    return %c0_i32, %c0_i32_0 : i32, i32
  }
  func.func @transform_2(%arg0: i32) -> (i32, i32) {
    %c0_i32 = arith.constant 0 : i32
    %c0_i32_0 = arith.constant 0 : i32
    %c0_i32_1 = arith.constant 0 : i32
    return %c0_i32, %c0_i32_0 : i32, i32
  }
  func.func @transform_3(%arg0: i32) -> (i32, i32) {
    %c0_i32 = arith.constant 0 : i32
    %c0_i32_0 = arith.constant 0 : i32
    %c0_i32_1 = arith.constant 0 : i32
    return %c0_i32, %c0_i32_0 : i32, i32
  }
  func.func @transform_4(%arg0: i32) -> (i32, i32) {
    %c0_i32 = arith.constant 0 : i32
    %c0_i32_0 = arith.constant 0 : i32
    %c0_i32_1 = arith.constant 0 : i32
    return %c0_i32, %c0_i32_0 : i32, i32
  }
  func.func @transform_5(%arg0: i32) -> (i32, i32) {
    %c0_i32 = arith.constant 0 : i32
    %c0_i32_0 = arith.constant 0 : i32
    %c0_i32_1 = arith.constant 0 : i32
    return %c0_i32, %c0_i32_0 : i32, i32
  }
  func.func @transform_6(%arg0: i32) -> (i32, i32) {
    %c0_i32 = arith.constant 0 : i32
    %c0_i32_0 = arith.constant 0 : i32
    %c0_i32_1 = arith.constant 0 : i32
    return %c0_i32, %c0_i32_0 : i32, i32
  }
  func.func @transform_7(%arg0: i32) -> (i32, i32) {
    %c0_i32 = arith.constant 0 : i32
    %c0_i32_0 = arith.constant 0 : i32
    return %arg0, %c0_i32 : i32, i32
  }
}

</mosaic_0001>

<bundles_post_ra>
// kernel: qnetwork_forward.1
= control target key start
LH: loop header
LB: loop body
LE: loop exit
PB: predicated region body
PF: predicated region fallthrough
CT: control target
= control target key end

     0   :  { %v1132_v2 = vmov 0   ;;  %vm99_vm0 = vcmask 261120   ;;  %s1478_s0 = inlined_call_operand.vmem [shape: bf16[8,32], index: 0, kind: input, shape index: {}]   ;;  %s1479_s1 = inlined_call_operand.vmem [shape: bf16[32,512], index: 1, kind: input, shape index: {}]   ;;  %s1480_s2 = inlined_call_operand.vmem [shape: f32[1,512], index: 2, kind: input, shape index: {}]   ;;  %s1481_s3 = inlined_call_operand.vmem [shape: bf16[512,256], index: 3, kind: input, shape index: {}]   ;;  %s1482_s4 = inlined_call_operand.vmem [shape: f32[1,256], index: 4, kind: input, shape index: {}]   ;;  %s1483_s5 = inlined_call_operand.vmem [shape: bf16[256,128], index: 5, kind: input, shape index: {}]   ;;  %s1484_s6 = inlined_call_operand.vmem [shape: f32[1,128], index: 6, kind: input, shape index: {}]   ;;  %s1485_s7 = inlined_call_operand.hbm [shape: f32[8,128], index: 7, kind: output, shape index: {}]  }
   0x1   :  { %v984_v0 = vld [vmem:[%s1479_s1 + $0x4] ss:$16 sps:$4 sm:$0xff]   ;;  %v986_v1 = vld [vmem:[%s1479_s1] ss:$16 sps:$4 sm:$0xff]   ;;  %135 = vmatprep.mubr.bf16.mxu0 %v1132_v2  ;;  %v992_v5 = vld [vmem:[%s1479_s1 + $0xc] ss:$16 sps:$4 sm:$0xff]  }
   0x2   :  { %103 = vmatprep.subr.bf16.mxu0 %v984_v0  ;;  %v987_v3 = vld [vmem:[%s1479_s1 + $0x24] ss:$16 sps:$4 sm:$0xff]   ;;  %v989_v4 = vld [vmem:[%s1479_s1 + $0x20] ss:$16 sps:$4 sm:$0xff]   ;;  %v990_v7 = vld [vmem:[%s1479_s1 + $0x8] ss:$16 sps:$4 sm:$0xff]  }
   0x3   :  { %104 = vmatpush1.bf16.msra.mxu0 %v986_v1  ;;  %v28_v6 = vld [vmem:[%s1478_s0] sm:$0xf]  ;;  %v996_v8 = vld [vmem:[%s1481_s3 + $0x4] ss:$8 sps:$4 sm:$0xff]   ;;  %v999_v10 = vld [vmem:[%s1481_s3 + $0x14] ss:$8 sps:$4 sm:$0xff]  }
   0x4   :  { %105 = vmatprep.subr.bf16.mxu0 %v987_v3  ;;  %v998_v9 = vld [vmem:[%s1481_s3] ss:$8 sps:$4 sm:$0xff]   ;;  %v995_v11 = vld [vmem:[%s1479_s1 + $0x2c] ss:$16 sps:$4 sm:$0xff]   ;;  %589 = vmatprep.subr.bf16.mxu1 %v996_v8  ;;  %v1001_v12 = vld [vmem:[%s1481_s3 + $0x10] ss:$8 sps:$4 sm:$0xff]  }
   0x5   :  { %590 = vmatpush1.bf16.msra.mxu1 %v998_v9  ;;  %v1002_v13 = vld [vmem:[%s1481_s3 + $0x24] ss:$8 sps:$4 sm:$0xff]   ;;  %v993_v14 = vld [vmem:[%s1479_s1 + $0x28] ss:$16 sps:$4 sm:$0xff]   ;;  %v1008_v17 = vld [vmem:[%s1481_s3 + $0x34] ss:$8 sps:$4 sm:$0xff]  }
   0x6   :  { %591 = vmatprep.subr.bf16.mxu1 %v999_v10  ;;  %v1006_v15 = vld [vmem:[%s1481_s3 + $0x104] ss:$8 sps:$4 sm:$0xff]   ;;  %v1007_v16 = vld [vmem:[%s1481_s3 + $0x20] ss:$8 sps:$4 sm:$0xff]   ;;  %v1012_v19 = vld [vmem:[%s1481_s3 + $0x114] ss:$8 sps:$4 sm:$0xff]  }
   0x7   :  { %106 = vmatpush1.bf16.msra.mxu0 %v989_v4  ;;  %v1004_v18 = vld [vmem:[%s1481_s3 + $0x100] ss:$8 sps:$4 sm:$0xff]   ;;  %v1013_v20 = vld [vmem:[%s1481_s3 + $0x30] ss:$8 sps:$4 sm:$0xff]   ;;  %v1014_v21 = vld [vmem:[%s1481_s3 + $0x44] ss:$8 sps:$4 sm:$0xff]  }
   0x8   :  { %144 = vmatprep.subr.bf16.mxu0 %v992_v5  ;;  %v1010_v22 = vld [vmem:[%s1481_s3 + $0x110] ss:$8 sps:$4 sm:$0xff]   ;;  %v1018_v23 = vld [vmem:[%s1481_s3 + $0x124] ss:$8 sps:$4 sm:$0xff]   ;;  %v1019_v24 = vld [vmem:[%s1481_s3 + $0x40] ss:$8 sps:$4 sm:$0xff]  }
   0x9   :  { %592 = vmatpush1.bf16.msra.mxu1 %v1001_v12  ;;  %v1020_v25 = vld [vmem:[%s1481_s3 + $0x54] ss:$8 sps:$4 sm:$0xff]   ;;  %v1016_v26 = vld [vmem:[%s1481_s3 + $0x120] ss:$8 sps:$4 sm:$0xff]   ;;  %v1025_v28 = vld [vmem:[%s1481_s3 + $0x50] ss:$8 sps:$4 sm:$0xff]  }
   0xa   :  { %873 = vmatmul.mubr.msk.bf16.vlgmr.msra.gmra.mrb[0].mxu0 %vm99_vm0, %v28_v6  ;;  %593 = vmatprep.subr.bf16.mxu1 %v1002_v13  ;;  %v1024_v27 = vld [vmem:[%s1481_s3 + $0x134] ss:$8 sps:$4 sm:$0xff]   ;;  %v1026_v29 = vld [vmem:[%s1481_s3 + $0x64] ss:$8 sps:$4 sm:$0xff]   ;;  %v1022_v30 = vld [vmem:[%s1481_s3 + $0x130] ss:$8 sps:$4 sm:$0xff]  }
   0xb   :  { %145 = vmatpush1.bf16.msra.mxu0 %v990_v7  ;;  %176 = vmatprep.mubr.bf16.mxu0 %v1132_v2  ;;  %v1030_v31 = vld [vmem:[%s1481_s3 + $0x144] ss:$8 sps:$4 sm:$0xff]   ;;  %v1031_v32 = vld [vmem:[%s1481_s3 + $0x60] ss:$8 sps:$4 sm:$0xff]   ;;  %v1032_v33 = vld [vmem:[%s1481_s3 + $0x74] ss:$8 sps:$4 sm:$0xff]  }
   0xc   :  { %146 = vmatprep.subr.bf16.mxu0 %v995_v11  ;;  %v1028_v34 = vld [vmem:[%s1481_s3 + $0x140] ss:$8 sps:$4 sm:$0xff]   ;;  %v1036_v35 = vld [vmem:[%s1481_s3 + $0x154] ss:$8 sps:$4 sm:$0xff]   ;;  %v1037_v36 = vld [vmem:[%s1481_s3 + $0x70] ss:$8 sps:$4 sm:$0xff]  }
   0xd   :  { %594 = vmatpush1.bf16.msra.mxu1 %v1007_v16  ;;  %v1038_v37 = vld [vmem:[%s1481_s3 + $0x84] ss:$8 sps:$4 sm:$0xff]   ;;  %v1034_v38 = vld [vmem:[%s1481_s3 + $0x150] ss:$8 sps:$4 sm:$0xff]   ;;  %v1043_v40 = vld [vmem:[%s1481_s3 + $0x80] ss:$8 sps:$4 sm:$0xff]  }
   0xe   :  { %595 = vmatprep.subr.bf16.mxu1 %v1008_v17  ;;  %v1042_v39 = vld [vmem:[%s1481_s3 + $0x164] ss:$8 sps:$4 sm:$0xff]   ;;  %v1044_v41 = vld [vmem:[%s1481_s3 + $0x94] ss:$8 sps:$4 sm:$0xff]   ;;  %v1040_v42 = vld [vmem:[%s1481_s3 + $0x160] ss:$8 sps:$4 sm:$0xff]  }
   0xf   :  { %147 = vmatpush1.bf16.msra.mxu0 %v993_v14  ;;  %v1048_v43 = vld [vmem:[%s1481_s3 + $0x174] ss:$8 sps:$4 sm:$0xff]   ;;  %v1049_v44 = vld [vmem:[%s1481_s3 + $0x90] ss:$8 sps:$4 sm:$0xff]   ;;  %v1050_v45 = vld [vmem:[%s1481_s3 + $0xa4] ss:$8 sps:$4 sm:$0xff]  }
  0x10   :  { %630 = vmatprep.subr.bf16.mxu0 %v1006_v15  ;;  %v1046_v46 = vld [vmem:[%s1481_s3 + $0x170] ss:$8 sps:$4 sm:$0xff]   ;;  %v1054_v47 = vld [vmem:[%s1481_s3 + $0x184] ss:$8 sps:$4 sm:$0xff]   ;;  %v1055_v48 = vld [vmem:[%s1481_s3 + $0xa0] ss:$8 sps:$4 sm:$0xff]  }
  0x11   :  { %596 = vmatpush1.bf16.msra.mxu1 %v1013_v20  ;;  %v1056_v49 = vld [vmem:[%s1481_s3 + $0xb4] ss:$8 sps:$4 sm:$0xff]   ;;  %v1052_v50 = vld [vmem:[%s1481_s3 + $0x180] ss:$8 sps:$4 sm:$0xff]   ;;  %v1061_v52 = vld [vmem:[%s1481_s3 + $0xb0] ss:$8 sps:$4 sm:$0xff]  }
  0x12   :  { %874 = vmatmul.mubr.msk.bf16.vlgmr.msra.gmra.mrb[4].mxu0 %vm99_vm0, %v28_v6  ;;  %597 = vmatprep.subr.bf16.mxu1 %v1014_v21  ;;  %v1060_v51 = vld [vmem:[%s1481_s3 + $0x194] ss:$8 sps:$4 sm:$0xff]   ;;  %v1062_v53 = vld [vmem:[%s1481_s3 + $0xc4] ss:$8 sps:$4 sm:$0xff]   ;;  %v1058_v54 = vld [vmem:[%s1481_s3 + $0x190] ss:$8 sps:$4 sm:$0xff]  }
  0x13   :  { %631 = vmatpush1.bf16.msra.mxu0 %v1004_v18  ;;  %v1066_v55 = vld [vmem:[%s1481_s3 + $0x1a4] ss:$8 sps:$4 sm:$0xff]   ;;  %v1067_v56 = vld [vmem:[%s1481_s3 + $0xc0] ss:$8 sps:$4 sm:$0xff]   ;;  %v1068_v57 = vld [vmem:[%s1481_s3 + $0xd4] ss:$8 sps:$4 sm:$0xff]  }
  0x14   :  { %632 = vmatprep.subr.bf16.mxu0 %v1012_v19  ;;  %v1064_v58 = vld [vmem:[%s1481_s3 + $0x1a0] ss:$8 sps:$4 sm:$0xff]  }
  0x15   :  { %598 = vmatpush1.bf16.msra.mxu1 %v1019_v24 }
  0x16   :  { %599 = vmatprep.subr.bf16.mxu1 %v1020_v25 }
  0x17   :  { %633 = vmatpush1.bf16.msra.mxu0 %v1010_v22 }
  0x18   :  { %634 = vmatprep.subr.bf16.mxu0 %v1018_v23 }
  0x19   :  { %600 = vmatpush1.bf16.msra.mxu1 %v1025_v28 }
  0x1a   :  { %601 = vmatprep.subr.bf16.mxu1 %v1026_v29 }
  0x1b   :  { %635 = vmatpush1.bf16.msra.mxu0 %v1016_v26 }
  0x1c   :  { %636 = vmatprep.subr.bf16.mxu0 %v1024_v27 }
  0x1d   :  { %602 = vmatpush1.bf16.msra.mxu1 %v1031_v32 }
  0x1e   :  { %603 = vmatprep.subr.bf16.mxu1 %v1032_v33 }
  0x1f   :  { %637 = vmatpush1.bf16.msra.mxu0 %v1022_v30 }
  0x20   :  { %638 = vmatprep.subr.bf16.mxu0 %v1030_v31 }
  0x21   :  { %604 = vmatpush1.bf16.msra.mxu1 %v1037_v36 }
  0x22   :  { %605 = vmatprep.subr.bf16.mxu1 %v1038_v37 }
  0x23   :  { %639 = vmatpush1.bf16.msra.mxu0 %v1028_v34 }
  0x24   :  { %640 = vmatprep.subr.bf16.mxu0 %v1036_v35 }
  0x25   :  { %606 = vmatpush1.bf16.msra.mxu1 %v1043_v40 }
  0x26   :  { %607 = vmatprep.subr.bf16.mxu1 %v1044_v41 }
  0x27   :  { %641 = vmatpush1.bf16.msra.mxu0 %v1034_v38 }
  0x28   :  { %642 = vmatprep.subr.bf16.mxu0 %v1042_v39 }
  0x29   :  { %608 = vmatpush1.bf16.msra.mxu1 %v1049_v44 }
  0x2a   :  { %609 = vmatprep.subr.bf16.mxu1 %v1050_v45 }
  0x2b   :  { %643 = vmatpush1.bf16.msra.mxu0 %v1040_v42 }
  0x2c   :  { %644 = vmatprep.subr.bf16.mxu0 %v1048_v43 }
  0x2d   :  { %610 = vmatpush1.bf16.msra.mxu1 %v1055_v48 }
  0x2e   :  { %611 = vmatprep.subr.bf16.mxu1 %v1056_v49 }
  0x2f   :  { %645 = vmatpush1.bf16.msra.mxu0 %v1046_v46 }
  0x30   :  { %646 = vmatprep.subr.bf16.mxu0 %v1054_v47 }
  0x31   :  { %612 = vmatpush1.bf16.msra.mxu1 %v1061_v52 }
  0x32   :  { %613 = vmatprep.subr.bf16.mxu1 %v1062_v53 }
  0x33   :  { %647 = vmatpush1.bf16.msra.mxu0 %v1052_v50 }
  0x34   :  { %648 = vmatprep.subr.bf16.mxu0 %v1060_v51 }
  0x37   :  { %649 = vmatpush1.bf16.msra.mxu0 %v1058_v54 }
  0x38   :  { %12 = vsyncpa [#allocation3], 0  ;;  %650 = vmatprep.subr.bf16.mxu0 %v1066_v55  ;;  %v1072_v59 = vld [vmem:[%s1481_s3 + $0x1b4] ss:$8 sps:$4 sm:$0xff]   ;;  %614 = vmatpush1.bf16.msra.mxu1 %v1067_v56  ;;  %v1073_v60 = vld [vmem:[%s1481_s3 + $0xd0] ss:$8 sps:$4 sm:$0xff]   ;;  %v39_v11 = vlaneseq }
  0x39   :  { %615 = vmatprep.subr.bf16.mxu1 %v1068_v57  ;;  %v1070_v61 = vld [vmem:[%s1481_s3 + $0x1b0] ss:$8 sps:$4 sm:$0xff]   ;;  %v1074_v62 = vld [vmem:[%s1481_s3 + $0xe4] ss:$8 sps:$4 sm:$0xff]   ;;  %v1076_v0 = vld [vmem:[%s1481_s3 + $0x1c0] ss:$8 sps:$4 sm:$0xff]  }
  0x3a   :  { %v1078_v63 = vld [vmem:[%s1481_s3 + $0x1c4] ss:$8 sps:$4 sm:$0xff]   ;;  %v1079_v1 = vld [vmem:[%s1481_s3 + $0xe0] ss:$8 sps:$4 sm:$0xff]   ;;  %v1080_v2 = vld [vmem:[%s1481_s3 + $0xf4] ss:$8 sps:$4 sm:$0xff]  }
  0x3b   :  { %651 = vmatpush1.bf16.msra.mxu0 %v1064_v58  ;;  %v1084_v3 = vld [vmem:[%s1481_s3 + $0x1d4] ss:$8 sps:$4 sm:$0xff]   ;;  %v1082_v4 = vld [vmem:[%s1481_s3 + $0x1d0] ss:$8 sps:$4 sm:$0xff]   ;;  %v1088_v6 = vld [vmem:[%s1481_s3 + $0x1e4] ss:$8 sps:$4 sm:$0xff]  }
  0x3c   :  { %652 = vmatprep.subr.bf16.mxu0 %v1072_v59  ;;  %616 = vmatpush1.bf16.msra.mxu1 %v1073_v60  ;;  %v1085_v5 = vld [vmem:[%s1481_s3 + $0xf0] ss:$8 sps:$4 sm:$0xff]   ;;  %v1086_v7 = vld [vmem:[%s1481_s3 + $0x1e0] ss:$8 sps:$4 sm:$0xff]   ;;  %v1091_v8 = vld [vmem:[%s1481_s3 + $0x1f4] ss:$8 sps:$4 sm:$0xff]  }
  0x3d   :  { %617 = vmatprep.subr.bf16.mxu1 %v1074_v62  ;;  %v1089_v9 = vld [vmem:[%s1481_s3 + $0x1f0] ss:$8 sps:$4 sm:$0xff]   ;;  %v1092_v10 = vld [vmem:[%s1483_s5 + $0x40] sm:$0xff]   ;;  %v1398_v12 = vshrl.u32 %v39_v11, 7  ;;  %v1094_v33 = vld [vmem:[%s1483_s5 + $0x48] sm:$0xff]   ;;  %s1133_s28 = smov [#allocation2]  }
  0x3e   :  { %v37_v14 = vld [vmem:[%s1480_s2] sm:$0xf]  ;;  %v1095_v39 = vld [vmem:[%s1483_s5 + $0x8] sm:$0xff]   ;;  %v1096_v42 = vld [vmem:[%s1483_s5 + $0x50] sm:$0xff]   ;;  %s857_s29 = sshll.u32 %s1133_s28, 4  ;;  %s858_s29 = int_to_ptr.vmem [resolvable:$true] %s857_s29 }
  0x3f   :  { %653 = vmatpush1.bf16.msra.mxu0 %v1070_v61  ;;  %v41_v13 = vsub.s32 0, %v1398_v12  ;;  %v45_v15 = vsub.s32 1, %v1398_v12  ;;  %v49_v21 = vsub.s32 2, %v1398_v12  ;;  %v53_v24 = vsub.s32 3, %v1398_v12  ;;  %v1093_v31 = vld [vmem:[%s1483_s5] sm:$0xff]   ;;  %v1097_v45 = vld [vmem:[%s1483_s5 + $0x10] sm:$0xff]   ;;  %p1113_p1 = scmp.lt.s32.totalorder %s858_s29, %s858_s29 }
  0x40   :  { %654 = vmatprep.subr.bf16.mxu0 %v1078_v63  ;;  %618 = vmatpush1.bf16.msra.mxu1 %v1079_v1  ;;  %v1098_v47 = vld [vmem:[%s1483_s5 + $0x58] sm:$0xff]   ;;  %v1100_v49 = vld [vmem:[%s1483_s5 + $0x60] sm:$0xff]   ;;  %v1102_v51 = vld [vmem:[%s1483_s5 + $0x68] sm:$0xff]   ;;  %s1108_s30 = scalar_lea.vmem %s858_s29, 128 }
  0x41   :  { %619 = vmatprep.subr.bf16.mxu1 %v1080_v2  ;;  %v42_v16 = vrot.slane %v37_v14, %v41_v13  ;;  %v46_v17 = vrot.slane %v37_v14, %v45_v15  ;;  %v50_v28 = vrot.slane %v37_v14, %v49_v21  ;;  %v54_v30 = vrot.slane %v37_v14, %v53_v24  ;;  %v1099_v48 = vld [vmem:[%s1483_s5 + $0x18] sm:$0xff]   ;;  %v1101_v50 = vld [vmem:[%s1483_s5 + $0x20] sm:$0xff]   ;;  %v1103_v52 = vld [vmem:[%s1483_s5 + $0x28] sm:$0xff]   ;;  %p1109_p0 = scmp.ne.s32.totalorder %s858_s29, %s1108_s30  ;;  %p1114_p2 = scmp.lt.s32.totalorder %s1108_s30, %s1108_s30 }
  0x42   :  { %v1104_v53 = vld [vmem:[%s1483_s5 + $0x70] sm:$0xff]   ;;  %v1106_v55 = vld [vmem:[%s1483_s5 + $0x78] sm:$0xff]   ;;  %v257_v57 = vld [vmem:[%s1482_s4] sm:$0x3] }
  0x43   :  { %655 = vmatpush1.bf16.msra.mxu0 %v1076_v0  ;;  %v1105_v54 = vld [vmem:[%s1483_s5 + $0x30] sm:$0xff]   ;;  %v1107_v56 = vld [vmem:[%s1483_s5 + $0x38] sm:$0xff]   ;;  %v262_v61 = vrot.slane %v257_v57, %v41_v13  ;;  %v266_v63 = vrot.slane %v257_v57, %v45_v15  ;;  %v939_v12 = vld [vmem:[%s1484_s6] ss:$0 sm:$0xff]  ;;  %p1115_p3 = por %p1114_p2, %p1113_p1 }
  0x44   :  { %656 = vmatprep.subr.bf16.mxu0 %v1084_v3  ;;  %620 = vmatpush1.bf16.msra.mxu1 %v1085_v5 }
  0x45   :  { %956 = vmatprep.subr.bf16.mxu1 %v1092_v10  ;;  %p1116_p4 = pnand %p1115_p3, %p1109_p0 }
  0x47   :  { %657 = vmatpush1.bf16.msra.mxu0 %v1082_v4 }
  0x48   :  { %658 = vmatprep.subr.bf16.mxu0 %v1088_v6 }
  0x4b   :  { %659 = vmatpush1.bf16.msra.mxu0 %v1086_v7 }
  0x4c   :  { %660 = vmatprep.subr.bf16.mxu0 %v1091_v8 }
  0x4f   :  { %661 = vmatpush1.bf16.msra.mxu0 %v1089_v9 }
  0xdd   :  { %v137_v18 = vpop.f32.mrb[0].mxu0 }
  0xde   :  { %v138_v19 = vadd.f32 %v137_v18, %v42_v16  ;;  %v139_v20 = vpop.f32.mrb[1].mxu0 }
  0xdf   :  { %v140_v22 = vadd.f32 %v139_v20, %v46_v17  ;;  %v141_v23 = vpop.f32.mrb[2].mxu0 }
  0xe0   :  { %v185_v25 = vmax.f32 %v138_v19, 0.0  ;;  %v142_v26 = vpop.f32.mrb[3].mxu0 }
  0xe1   :  { %v186_v27 = vmax.f32 %v140_v22, 0.0 }
  0xe2   :  { %v189_v32 = vpack.c.bf16 %v185_v25, %v185_v25 }
  0xe3   :  { %v190_v29 = vpack.c.bf16 %v186_v27, %v186_v27 }
  0xe5   :  { %v178_v34 = vpop.f32.mrb[4].mxu0  ;;  %621 = vmatprep.mubr.bf16.mxu1 %v190_v29 }
  0xe6   :  { %v179_v35 = vadd.f32 %v178_v34, %v50_v28  ;;  %v180_v36 = vpop.f32.mrb[5].mxu0  ;;  %622 = vmatmul.mubr.bf16.vlgmr.msra.gmra.mrb[0].mxu1 %v189_v32 }
  0xe7   :  { %v181_v37 = vadd.f32 %v180_v36, %v54_v30  ;;  %v182_v38 = vpop.f32.mrb[6].mxu0  ;;  %957 = vmatpush3.bf16.msra.mxu1 %v1093_v31 }
  0xe8   :  { %v187_v40 = vmax.f32 %v179_v35, 0.0  ;;  %v183_v41 = vpop.f32.mrb[7].mxu0  ;;  %958 = vmatprep.subr.bf16.mxu1 %v1094_v33 }
  0xe9   :  { %v188_v43 = vmax.f32 %v181_v37, 0.0 }
  0xea   :  { %v191_v46 = vpack.c.bf16 %v187_v40, %v187_v40 }
  0xeb   :  { %v192_v44 = vpack.c.bf16 %v188_v43, %v188_v43  ;;  %959 = vmatpush3.bf16.msra.mxu1 %v1095_v39 }
  0xec   :  { %960 = vmatprep.subr.bf16.mxu1 %v1096_v42 }
  0xed   :  { %662 = vmatprep.mubr.bf16.mxu0 %v192_v44 }
  0xee   :  { %663 = vmatmul.mubr.bf16.vlgmr.msra.gmra.mrb[8].mxu0 %v191_v46 }
  0xef   :  { %961 = vmatpush3.bf16.msra.mxu1 %v1097_v45 }
  0xf0   :  { %962 = vmatprep.subr.bf16.mxu1 %v1098_v47 }
  0xf3   :  { %963 = vmatpush3.bf16.msra.mxu1 %v1099_v48 }
  0xf4   :  { %964 = vmatprep.subr.bf16.mxu1 %v1100_v49 }
  0xf7   :  { %965 = vmatpush3.bf16.msra.mxu1 %v1101_v50 }
  0xf8   :  { %966 = vmatprep.subr.bf16.mxu1 %v1102_v51 }
  0xfb   :  { %967 = vmatpush3.bf16.msra.mxu1 %v1103_v52 }
  0xfc   :  { %968 = vmatprep.subr.bf16.mxu1 %v1104_v53 }
  0xff   :  { %969 = vmatpush3.bf16.msra.mxu1 %v1105_v54 }
 0x100   :  { %970 = vmatprep.subr.bf16.mxu1 %v1106_v55 }
 0x103   :  { %971 = vmatpush3.bf16.msra.mxu1 %v1107_v56 }
 0x1b9   :  { %v623_v58 = vpop.f32.mrb[0].mxu1 }
 0x1ba   :  { %v625_v59 = vpop.f32.mrb[1].mxu1  ;;  %v624_v0 = vadd.f32 %v623_v58, %v262_v61 }
 0x1bb   :  { %v627_v60 = vpop.f32.mrb[2].mxu1  ;;  %v626_v1 = vadd.f32 %v625_v59, %v266_v63 }
 0x1bc   :  { %v628_v62 = vpop.f32.mrb[3].mxu1 }
 0x1c1   :  { %v664_v2 = vpop.f32.mrb[8].mxu0 }
 0x1c2   :  { %v665_v3 = vadd.f32 %v664_v2, %v624_v0  ;;  %v666_v4 = vpop.f32.mrb[9].mxu0 }
 0x1c3   :  { %v667_v5 = vadd.f32 %v666_v4, %v626_v1  ;;  %v668_v6 = vpop.f32.mrb[10].mxu0 }
 0x1c4   :  { %v671_v7 = vmax.f32 %v665_v3, 0.0  ;;  %v669_v8 = vpop.f32.mrb[11].mxu0 }
 0x1c5   :  { %v672_v9 = vmax.f32 %v667_v5, 0.0 }
 0x1c6   :  { %v673_v11 = vpack.c.bf16 %v671_v7, %v671_v7 }
 0x1c7   :  { %v674_v10 = vpack.c.bf16 %v672_v9, %v672_v9 }
 0x1c9   :  { %842 = vmatprep.mubr.bf16.mxu1 %v674_v10 }
 0x1ca   :  { %843 = vmatmul.mubr.bf16.vlgmr.msra.gmra.mrb[4].mxu1 %v673_v11 }
 0x29d   :  { %v972_v14 = vpop.f32.mrb[4].mxu1 }
 0x29e   :  { %v973_v13 = vpop.f32.mrb[5].mxu1 }
 0x29f   :  { %v974_v15 = vadd.f32 %v973_v13, %v972_v14  ;;  %v975_v16 = vpop.f32.mrb[6].mxu1 }
 0x2a0   :  { %v976_v17 = vpop.f32.mrb[7].mxu1 }
 0x2a1   :  { %v845_v18 = vadd.f32 %v974_v15, %v939_v12 }
 0x2a3   :  { %850 = vst [vmem:[#allocation2] sm:$0xff] %v845_v18 }
 0x2a4   :  { %1119 = shalt.err (!%p1116_p4)
}
 0x2a5   :  { %s1120_s10 = scalar_lea.hbm %s1485_s7, 128 }
 0x2a6   :  { %p1121_p5 = scmp.ne.s32.totalorder %s1485_s7, %s1120_s10  ;;  %p1124_p6 = scmp.lt.u32.totalorder %s1120_s10, %s1485_s7 }
 0x2a8   :  { %p1126_p7 = pnand %p1124_p6, %p1121_p5 }
 0x2aa   :  { %1129 = shalt.err (!%p1126_p7)
}
 0x2ab   :  { %860 = dma.vmem_to_hbm [thread:$0]  %s858_s29, 128, %s1485_s7, [#allocation3]  }
 0x2ac   :  { %1130 = dma.done.wait [#allocation3], 128  }
 0x2ad   :  { %1131 = vsyncadd [#allocation3], 4294967168 }
 0x2ae   :  { %864 = vsyncpa [#allocation3], 1 }

</bundles_post_ra>
